<compile_context>
chip_gen: v6e
topology: v6e:2x2x1
jax: 0.10.0
libtpu: 0.0.40
codegen_flags: <defaults>
</compile_context>

<pallas_src>
import functools

import jax
import jax.numpy as jnp
from jax.experimental import pallas as pl
from jax.experimental.pallas import tpu as pltpu

EPS = 1e-5
NEG_SLOPE = 0.2
LANE = 128
VMEM_LIMIT = 32 * 1024 * 1024   # explicit; <= default scoped VMEM on v6e/v7x


def _round_up(n, m):
    return ((n + m - 1) // m) * m


# ----------------------------------------------------------------------------
# Kernels
# ----------------------------------------------------------------------------
def _hidden_stack_kernel(num_hidden, x_ref, w_ref, p_ref, h_ref):
    """Fused Linear -> LeakyReLU(0.2) -> BatchNorm1d for all hidden layers.

    x_ref: (B, D) f32     w_ref: (L, D, D) bf16 (pre-transposed, zero-padded)
    p_ref: (L, 8, D) f32  rows 0/1/2 = bias / gamma / beta
    h_ref: (B, D) f32 output (final hidden activations)
    """
    h = x_ref[...]
    inv_b = 1.0 / x_ref.shape[0]          # static batch size

    for i in range(num_hidden):
        w = w_ref[i]                       # (D, D) bf16 — fed to MXU as-is
        pv = p_ref[i]                      # (8, D) f32
        b = pv[0:1, :]
        gamma = pv[1:2, :]
        beta = pv[2:3, :]

        # Linear (bf16 x bf16 -> f32 acc) + LeakyReLU(0.2)
        h = jnp.dot(h.astype(jnp.bfloat16), w,
                    preferred_element_type=jnp.float32) + b
        h = jnp.where(h > 0, h, NEG_SLOPE * h)

        # BatchNorm1d (training-mode batch stats, biased variance).
        # Single-pass moments + per-column affine: h_norm = h * s + t.
        sum1 = jnp.sum(h, axis=0, keepdims=True)
        sum2 = jnp.sum(h * h, axis=0, keepdims=True)
        mean = sum1 * inv_b
        var = jnp.maximum(sum2 * inv_b - mean * mean, 0.0)
        s = gamma * jax.lax.rsqrt(var + EPS)
        t = beta - mean * s
        h = h * s + t

    h_ref[...] = h


def _output_kernel(h_ref, w_ref, b_ref, o_ref):
    """One output-column tile: sigmoid(h @ W_out_tile + b_tile)."""
    y = jnp.dot(h_ref[...].astype(jnp.bfloat16), w_ref[...],
                preferred_element_type=jnp.float32) + b_ref[...]
    # sigmoid(y) == 0.5 * (tanh(0.5*y) + 1): single EUP op per element.
    o_ref[...] = 0.5 * (jnp.tanh(0.5 * y) + 1.0)


# ----------------------------------------------------------------------------
# Parameter construction / packing
# ----------------------------------------------------------------------------
def init_decoder_params(key, latent_dim, hidden_dims, output_dim):
    """Logical (unpadded) parameters mirroring the PyTorch module __init__.

    Weights stored in bfloat16 (MXU-native); biases / BN params in f32.
    Returns (hidden_params, out_params):
      hidden_params: list of (w (out,in) bf16, b (out,), gamma (out,), beta (out,))
      out_params:    (w (out,in) bf16, b (out,))
    """
    hidden_params = []
    dims = [latent_dim] + list(hidden_dims)
    for i in range(len(hidden_dims)):
        fan_in, fan_out = dims[i], dims[i + 1]
        key, kw, kb = jax.random.split(key, 3)
        bound_w = (6.0 / (fan_in + fan_out)) ** 0.5            # xavier_uniform_
        w = jax.random.uniform(kw, (fan_out, fan_in), jnp.float32, -bound_w, bound_w)
        w = w.astype(jnp.bfloat16)
        bound_b = 1.0 / (fan_in ** 0.5)                        # default Linear bias
        b = jax.random.uniform(kb, (fan_out,), jnp.float32, -bound_b, bound_b)
        gamma = jnp.ones((fan_out,), jnp.float32)
        beta = jnp.zeros((fan_out,), jnp.float32)
        hidden_params.append((w, b, gamma, beta))

    fan_in, fan_out = hidden_dims[-1], output_dim
    key, kw, kb = jax.random.split(key, 3)
    bound_w = (6.0 / (fan_in + fan_out)) ** 0.5
    w = jax.random.uniform(kw, (fan_out, fan_in), jnp.float32, -bound_w, bound_w)
    w = w.astype(jnp.bfloat16)
    bound_b = 1.0 / (fan_in ** 0.5)
    b = jax.random.uniform(kb, (fan_out,), jnp.float32, -bound_b, bound_b)
    return hidden_params, (w, b)


def pack_decoder_params(latent_dim, hidden_dims, output_dim, hidden_params, out_params):
    """Pad all feature dims to multiples of 128 and stack per-layer params.

    Padding is zero for weights/bias/beta and one for gamma, so padded columns
    stay exactly zero through Linear + LeakyReLU + BatchNorm.
    """
    dims = [latent_dim] + list(hidden_dims)
    D = max(_round_up(d, LANE) for d in dims)       # common padded hidden width
    L = len(hidden_dims)

    w_h = jnp.zeros((L, D, D), jnp.bfloat16)
    p_h = jnp.zeros((L, 8, D), jnp.float32)
    p_h = p_h.at[:, 1, :].set(1.0)                  # gamma padding = 1
    for i, (w, b, gamma, beta) in enumerate(hidden_params):
        out_d, in_d = w.shape
        w_h = w_h.at[i, :in_d, :out_d].set(w.T.astype(jnp.bfloat16))
        p_h = p_h.at[i, 0, :out_d].set(b)
        p_h = p_h.at[i, 1, :out_d].set(gamma)
        p_h = p_h.at[i, 2, :out_d].set(beta)

    w, b = out_params
    out_d, in_d = w.shape
    n_pad = _round_up(out_d, LANE)
    w_out = jnp.zeros((D, n_pad), jnp.bfloat16).at[:in_d, :out_d].set(w.T)
    b_out = jnp.zeros((1, n_pad), jnp.float32).at[0, :out_d].set(b)
    return (w_h, p_h, w_out, b_out)


# ----------------------------------------------------------------------------
# Forward
# ----------------------------------------------------------------------------
def _pick_tn(n_pad, target=512):
    """Largest multiple of 128 that divides n_pad and is <= target.

    target=512 keeps the double-buffered weight tile comfortably inside v7x's
    smaller VMEM; v5e/v6e can use 1024 for slightly better DMA efficiency.
    """
    tn = min(n_pad, target)
    while n_pad % tn:
        tn -= LANE
    return tn


def decoder_forward(x, packed, num_hidden, output_dim, tn_target=512):
    w_h, p_h, w_out, b_out = packed
    D = w_h.shape[1]
    n_pad = w_out.shape[1]
    batch, latent = x.shape

    # Pad latent (feature) dim only — never the batch dim (BN stats span it).
    x_pad = jnp.pad(x, ((0, 0), (0, D - latent)))

    # --- Call 1: fused hidden stack (gridless; everything is tiny in VMEM). ---
    h = pl.pallas_call(
        functools.partial(_hidden_stack_kernel, num_hidden),
        out_shape=jax.ShapeDtypeStruct((batch, D), jnp.float32),
        in_specs=[pl.BlockSpec(memory_space=pltpu.MemorySpace.VMEM)] * 3,
        out_specs=pl.BlockSpec(memory_space=pltpu.MemorySpace.VMEM),
        compiler_params=pltpu.CompilerParams(vmem_limit_bytes=VMEM_LIMIT),
    )(x_pad, w_h, p_h)

    # --- Call 2: output Linear + sigmoid, column-tiled over the N axis. -------
    # Weight tiles stream through a double-buffered pipeline; "parallel" lets
    # the two v7x TensorCores split the columns.
    tn = _pick_tn(n_pad, tn_target)
    grid = (n_pad // tn,)
    y = pl.pallas_call(
        _output_kernel,
        out_shape=jax.ShapeDtypeStruct((batch, n_pad), jnp.float32),
        grid=grid,
        in_specs=[
            pl.BlockSpec((batch, D), lambda j: (0, 0)),    # hidden acts (whole)
            pl.BlockSpec((D, tn), lambda j: (0, j)),       # weight column tile
            pl.BlockSpec((1, tn), lambda j: (0, j)),       # bias tile
        ],
        out_specs=pl.BlockSpec((batch, tn), lambda j: (0, j)),
        compiler_params=pltpu.CompilerParams(
            dimension_semantics=("parallel",),
            vmem_limit_bytes=VMEM_LIMIT),
    )(h, w_out, b_out)

    return y[:, :output_dim]


# ----------------------------------------------------------------------------
# Pure-JAX reference (PyTorch-style two-pass BatchNorm) for verification.
# ----------------------------------------------------------------------------
def decoder_reference(x, hidden_params, out_params):
    h = x
    for (w, b, gamma, beta) in hidden_params:
        h = h @ w.astype(jnp.float32).T + b
        h = jnp.where(h > 0, h, NEG_SLOPE * h)
        mean = jnp.mean(h, axis=0, keepdims=True)
        var = jnp.mean((h - mean) ** 2, axis=0, keepdims=True)
        h = (h - mean) / jnp.sqrt(var + EPS) * gamma + beta
    w, b = out_params
    return jax.nn.sigmoid(h @ w.astype(jnp.float32).T + b)


if __name__ == "__main__":
    latent_dim = 16
    hidden_dims = [32, 32]
    output_dim = 64
    batch = 8

    key = jax.random.PRNGKey(0)
    key, kx = jax.random.split(key)
    x = jax.random.normal(kx, (batch, latent_dim), jnp.float32)

    hidden_params, out_params = init_decoder_params(
        key, latent_dim, hidden_dims, output_dim)
    packed = pack_decoder_params(
        latent_dim, hidden_dims, output_dim, hidden_params, out_params)

    x_hat = decoder_forward(x, packed, num_hidden=len(hidden_dims),
                            output_dim=output_dim)
    jax.block_until_ready(x_hat)

    ref = decoder_reference(x, hidden_params, out_params)
    assert x_hat.shape == (batch, output_dim)
    err = float(jnp.max(jnp.abs(x_hat - ref)))
    # bf16 MXU operands + single-pass variance: slightly looser tolerance than
    # a pure-f32 comparison (drift bounded by per-layer BN renormalization).
    assert err < 2e-2, f"mismatch vs reference (max abs err {err})"

    print("KERNEL_OK")
</pallas_src>

<mosaic_0001>
module attributes {stable_mosaic.version = 11 : i64} {
  func.func @_hidden_stack_kernel(%arg0: memref<8x128xf32, #tpu.memory_space<vmem>>, %arg1: memref<2x128x128xbf16, #tpu.memory_space<vmem>>, %arg2: memref<2x8x128xf32, #tpu.memory_space<vmem>>, %arg3: memref<8x128xf32, #tpu.memory_space<vmem>>) attributes {dimension_semantics = [], scalar_prefetch = 0 : i64, scratch_operands = 0 : i64, tpu.core_type = #tpu.core_type<tc>} {
    %c0 = arith.constant 0 : index
    %c0_0 = arith.constant 0 : index
    %0 = vector.load %arg0[%c0, %c0_0] : memref<8x128xf32, #tpu.memory_space<vmem>>, vector<8x128xf32>
    %c0_1 = arith.constant 0 : index
    %c0_2 = arith.constant 0 : index
    %c0_3 = arith.constant 0 : index
    %1 = vector.load %arg1[%c0_1, %c0_2, %c0_3] : memref<2x128x128xbf16, #tpu.memory_space<vmem>>, vector<1x128x128xbf16>
    %2 = vector.shape_cast %1 : vector<1x128x128xbf16> to vector<128x128xbf16>
    %c0_4 = arith.constant 0 : index
    %c0_5 = arith.constant 0 : index
    %c0_6 = arith.constant 0 : index
    %3 = vector.load %arg2[%c0_4, %c0_5, %c0_6] : memref<2x8x128xf32, #tpu.memory_space<vmem>>, vector<1x8x128xf32>
    %4 = vector.shape_cast %3 : vector<1x8x128xf32> to vector<8x128xf32>
    %5 = vector.extract_strided_slice %4 {offsets = [0, 0], sizes = [1, 128], strides = [1, 1]} : vector<8x128xf32> to vector<1x128xf32>
    %6 = vector.extract_strided_slice %4 {offsets = [1, 0], sizes = [1, 128], strides = [1, 1]} : vector<8x128xf32> to vector<1x128xf32>
    %7 = vector.extract_strided_slice %4 {offsets = [2, 0], sizes = [1, 128], strides = [1, 1]} : vector<8x128xf32> to vector<1x128xf32>
    %8 = arith.truncf %0 : vector<8x128xf32> to vector<8x128xbf16>
    %cst = arith.constant dense<0.000000e+00> : vector<8x128xf32>
    %9 = tpu.matmul %8, %2, %cst {dimension_numbers = #tpu.dot_dimension_numbers<[1], [0], [0], [1], [0, 0, 1, 1], [], []>} : vector<8x128xbf16>, vector<128x128xbf16>, vector<8x128xf32> -> vector<8x128xf32>
    %10 = vector.broadcast %5 : vector<1x128xf32> to vector<8x128xf32>
    %11 = arith.addf %9, %10 : vector<8x128xf32>
    %cst_7 = arith.constant 0.000000e+00 : f32
    %12 = vector.broadcast %cst_7 : f32 to vector<8x128xf32>
    %13 = arith.cmpf ogt, %11, %12 : vector<8x128xf32>
    %cst_8 = arith.constant 2.000000e-01 : f32
    %14 = vector.broadcast %cst_8 : f32 to vector<8x128xf32>
    %15 = arith.mulf %14, %11 : vector<8x128xf32>
    %16 = arith.select %13, %11, %15 : vector<8x128xi1>, vector<8x128xf32>
    %cst_9 = arith.constant dense<0.000000e+00> : vector<128xf32>
    %17 = vector.multi_reduction <add>, %16, %cst_9 [0] : vector<8x128xf32> to vector<128xf32>
    %18 = vector.shape_cast %17 : vector<128xf32> to vector<1x128xf32>
    %19 = arith.mulf %16, %16 : vector<8x128xf32>
    %cst_10 = arith.constant dense<0.000000e+00> : vector<128xf32>
    %20 = vector.multi_reduction <add>, %19, %cst_10 [0] : vector<8x128xf32> to vector<128xf32>
    %21 = vector.shape_cast %20 : vector<128xf32> to vector<1x128xf32>
    %cst_11 = arith.constant 1.250000e-01 : f32
    %22 = vector.broadcast %cst_11 : f32 to vector<1x128xf32>
    %23 = arith.mulf %18, %22 : vector<1x128xf32>
    %cst_12 = arith.constant 1.250000e-01 : f32
    %24 = vector.broadcast %cst_12 : f32 to vector<1x128xf32>
    %25 = arith.mulf %21, %24 : vector<1x128xf32>
    %26 = arith.mulf %23, %23 : vector<1x128xf32>
    %27 = arith.subf %25, %26 : vector<1x128xf32>
    %cst_13 = arith.constant 0.000000e+00 : f32
    %28 = vector.broadcast %cst_13 : f32 to vector<1x128xf32>
    %29 = arith.maximumf %27, %28 : vector<1x128xf32>
    %cst_14 = arith.constant 9.99999974E-6 : f32
    %30 = vector.broadcast %cst_14 : f32 to vector<1x128xf32>
    %31 = arith.addf %29, %30 : vector<1x128xf32>
    %32 = math.rsqrt %31 : vector<1x128xf32>
    %33 = arith.mulf %6, %32 : vector<1x128xf32>
    %34 = arith.mulf %23, %33 : vector<1x128xf32>
    %35 = arith.subf %7, %34 : vector<1x128xf32>
    %36 = vector.broadcast %33 : vector<1x128xf32> to vector<8x128xf32>
    %37 = arith.mulf %16, %36 : vector<8x128xf32>
    %38 = vector.broadcast %35 : vector<1x128xf32> to vector<8x128xf32>
    %39 = arith.addf %37, %38 : vector<8x128xf32>
    %c1 = arith.constant 1 : index
    %c0_15 = arith.constant 0 : index
    %c0_16 = arith.constant 0 : index
    %40 = vector.load %arg1[%c1, %c0_15, %c0_16] : memref<2x128x128xbf16, #tpu.memory_space<vmem>>, vector<1x128x128xbf16>
    %41 = vector.shape_cast %40 : vector<1x128x128xbf16> to vector<128x128xbf16>
    %c1_17 = arith.constant 1 : index
    %c0_18 = arith.constant 0 : index
    %c0_19 = arith.constant 0 : index
    %42 = vector.load %arg2[%c1_17, %c0_18, %c0_19] : memref<2x8x128xf32, #tpu.memory_space<vmem>>, vector<1x8x128xf32>
    %43 = vector.shape_cast %42 : vector<1x8x128xf32> to vector<8x128xf32>
    %44 = vector.extract_strided_slice %43 {offsets = [0, 0], sizes = [1, 128], strides = [1, 1]} : vector<8x128xf32> to vector<1x128xf32>
    %45 = vector.extract_strided_slice %43 {offsets = [1, 0], sizes = [1, 128], strides = [1, 1]} : vector<8x128xf32> to vector<1x128xf32>
    %46 = vector.extract_strided_slice %43 {offsets = [2, 0], sizes = [1, 128], strides = [1, 1]} : vector<8x128xf32> to vector<1x128xf32>
    %47 = arith.truncf %39 : vector<8x128xf32> to vector<8x128xbf16>
    %cst_20 = arith.constant dense<0.000000e+00> : vector<8x128xf32>
    %48 = tpu.matmul %47, %41, %cst_20 {dimension_numbers = #tpu.dot_dimension_numbers<[1], [0], [0], [1], [0, 0, 1, 1], [], []>} : vector<8x128xbf16>, vector<128x128xbf16>, vector<8x128xf32> -> vector<8x128xf32>
    %49 = vector.broadcast %44 : vector<1x128xf32> to vector<8x128xf32>
    %50 = arith.addf %48, %49 : vector<8x128xf32>
    %cst_21 = arith.constant 0.000000e+00 : f32
    %51 = vector.broadcast %cst_21 : f32 to vector<8x128xf32>
    %52 = arith.cmpf ogt, %50, %51 : vector<8x128xf32>
    %cst_22 = arith.constant 2.000000e-01 : f32
    %53 = vector.broadcast %cst_22 : f32 to vector<8x128xf32>
    %54 = arith.mulf %53, %50 : vector<8x128xf32>
    %55 = arith.select %52, %50, %54 : vector<8x128xi1>, vector<8x128xf32>
    %cst_23 = arith.constant dense<0.000000e+00> : vector<128xf32>
    %56 = vector.multi_reduction <add>, %55, %cst_23 [0] : vector<8x128xf32> to vector<128xf32>
    %57 = vector.shape_cast %56 : vector<128xf32> to vector<1x128xf32>
    %58 = arith.mulf %55, %55 : vector<8x128xf32>
    %cst_24 = arith.constant dense<0.000000e+00> : vector<128xf32>
    %59 = vector.multi_reduction <add>, %58, %cst_24 [0] : vector<8x128xf32> to vector<128xf32>
    %60 = vector.shape_cast %59 : vector<128xf32> to vector<1x128xf32>
    %cst_25 = arith.constant 1.250000e-01 : f32
    %61 = vector.broadcast %cst_25 : f32 to vector<1x128xf32>
    %62 = arith.mulf %57, %61 : vector<1x128xf32>
    %cst_26 = arith.constant 1.250000e-01 : f32
    %63 = vector.broadcast %cst_26 : f32 to vector<1x128xf32>
    %64 = arith.mulf %60, %63 : vector<1x128xf32>
    %65 = arith.mulf %62, %62 : vector<1x128xf32>
    %66 = arith.subf %64, %65 : vector<1x128xf32>
    %cst_27 = arith.constant 0.000000e+00 : f32
    %67 = vector.broadcast %cst_27 : f32 to vector<1x128xf32>
    %68 = arith.maximumf %66, %67 : vector<1x128xf32>
    %cst_28 = arith.constant 9.99999974E-6 : f32
    %69 = vector.broadcast %cst_28 : f32 to vector<1x128xf32>
    %70 = arith.addf %68, %69 : vector<1x128xf32>
    %71 = math.rsqrt %70 : vector<1x128xf32>
    %72 = arith.mulf %45, %71 : vector<1x128xf32>
    %73 = arith.mulf %62, %72 : vector<1x128xf32>
    %74 = arith.subf %46, %73 : vector<1x128xf32>
    %75 = vector.broadcast %72 : vector<1x128xf32> to vector<8x128xf32>
    %76 = arith.mulf %55, %75 : vector<8x128xf32>
    %77 = vector.broadcast %74 : vector<1x128xf32> to vector<8x128xf32>
    %78 = arith.addf %76, %77 : vector<8x128xf32>
    %c0_29 = arith.constant 0 : index
    %c0_30 = arith.constant 0 : index
    %79 = vector.load %arg3[%c0_29, %c0_30] : memref<8x128xf32, #tpu.memory_space<vmem>>, vector<8x128xf32>
    tpu.vector_store %arg3[%c0_29, %c0_30], %78 {strides = array<i32>} : memref<8x128xf32, #tpu.memory_space<vmem>>, vector<8x128xf32>,
    return
  }
}

</mosaic_0001>

<bundles_post_ra>
// kernel: tpu_custom_call.1
= control target key start
LH: loop header
LB: loop body
LE: loop exit
PB: predicated region body
PF: predicated region fallthrough
CT: control target
= control target key end

     0   :  { %8 = vsyncpa [#allocation3], 0  ;;  %s610_s0 = inlined_call_operand.hbm [shape: f32[8,128], index: 0, kind: input, shape index: {}]   ;;  %s611_s1 = inlined_call_operand.hbm [shape: bf16[2,128,128], index: 1, kind: input, shape index: {}]   ;;  %s612_s2 = inlined_call_operand.hbm [shape: f32[2,8,128], index: 2, kind: input, shape index: {}]   ;;  %s613_s3 = inlined_call_operand.hbm [shape: f32[8,128], index: 3, kind: output, shape index: {}]  }
   0x1   :  { %9 = vsyncpa [#allocation6], 0 }
   0x2   :  { %10 = vsyncpa [#allocation4], 0  ;;  %s563_s12 = smov [#allocation5]  }
   0x3   :  { %s26_s13 = sshll.u32 %s563_s12, 4  ;;  %s27_s13 = int_to_ptr.vmem [resolvable:$true] %s26_s13 }
   0x4   :  { %s485_s14 = scalar_lea.vmem %s27_s13, 2048  ;;  %p490_p1 = scmp.lt.s32.totalorder %s27_s13, %s27_s13 }
   0x5   :  { %p486_p0 = scmp.ne.s32.totalorder %s27_s13, %s485_s14  ;;  %p491_p2 = scmp.lt.s32.totalorder %s485_s14, %s485_s14 }
   0x7   :  { %p492_p3 = por %p491_p2, %p490_p1 }
   0x9   :  { %p493_p4 = pnand %p492_p3, %p486_p0 }
   0xb   :  { %496 = shalt.err (!%p493_p4)
}
   0xc   :  { %s564_s15 = smov 64   ;;  %s565_s16 = smov 4  }
   0xd   :  { %32 = dma.hbm_to_vmem [thread:$0]  %s611_s1, 2048, %s27_s13, [#allocation6], %s564_s15, %s564_s15, %s565_s16  }
   0xe   :  { %s566_s19 = smov [#allocation2]   ;;  %s567_s21 = smov [#allocation7]  }
   0xf   :  { %s17_s20 = sshll.u32 %s566_s19, 4  ;;  %s38_s22 = sshll.u32 %s567_s21, 4  ;;  %s18_s20 = int_to_ptr.vmem [resolvable:$true] %s17_s20  ;;  %s39_s22 = int_to_ptr.vmem [resolvable:$true] %s38_s22 }
  0x10   :  { %s505_s23 = scalar_lea.vmem %s18_s20, 128  ;;  %p510_p6 = scmp.lt.s32.totalorder %s18_s20, %s18_s20 }
  0x11   :  { %p506_p5 = scmp.ne.s32.totalorder %s18_s20, %s505_s23  ;;  %p511_p7 = scmp.lt.s32.totalorder %s505_s23, %s505_s23 }
  0x13   :  { %p512_p8 = por %p511_p7, %p510_p6 }
  0x15   :  { %p513_p9 = pnand %p512_p8, %p506_p5 }
  0x17   :  { %516 = shalt.err (!%p513_p9)
}
  0x18   :  { %20 = dma.hbm_to_vmem [thread:$0]  %s610_s0, 128, %s18_s20, [#allocation3]  }
  0x19   :  { %s525_s26 = scalar_lea.vmem %s39_s22, 256  ;;  %p530_p11 = scmp.lt.s32.totalorder %s39_s22, %s39_s22 }
  0x1a   :  { %p526_p10 = scmp.ne.s32.totalorder %s39_s22, %s525_s26  ;;  %p531_p12 = scmp.lt.s32.totalorder %s525_s26, %s525_s26 }
  0x1c   :  { %p532_p13 = por %p531_p12, %p530_p11 }
  0x1e   :  { %p533_p0 = pnand %p532_p13, %p526_p10 }
  0x20   :  { %536 = shalt.err (!%p533_p0)
}
  0x21   :  { %s568_s1 = smov 128   ;;  %s569_s27 = smov 8  }
  0x22   :  { %44 = dma.hbm_to_vmem [thread:$0]  %s612_s2, 256, %s39_s22, [#allocation6], %s568_s1, %s568_s1, %s569_s27  }
  0x23   :  { %557 = dma.done.wait [#allocation3], 128  }
  0x24   :  { %558 = vsyncadd [#allocation3], 4294967168 }
  0x25   :  { %559 = dma.done.wait [#allocation6], 2304  }
  0x26   :  { %560 = vsyncadd [#allocation6], 4294964992  ;;  %v570_v0 = vmov 0.0   ;;  %vm571_vm0 = vmmov 0   ;;  %v457_v1 = vld [vmem:[#allocation5 + $0x38] sm:$0xff]   ;;  %v458_v2 = vld [vmem:[#allocation5 + $0x30] sm:$0xff]   ;;  %v74_v19 = vlaneseq }
  0x27   :  { %407 = vmatprep.subr.bf16.mxu0 %v570_v0  ;;  %423 = vmatprep.mubr.msk.bf16.mxu0 %vm571_vm0, %v570_v0  ;;  %v459_v3 = vld [vmem:[#allocation5 + $0x28] sm:$0xff]   ;;  %v460_v4 = vld [vmem:[#allocation5 + $0x20] sm:$0xff]   ;;  %v461_v5 = vld [vmem:[#allocation5 + $0x18] sm:$0xff]   ;;  %s572_s0 = smov [#allocation8]  }
  0x28   :  { %427 = vmatprep.subr.bf16.mxu1 %v570_v0  ;;  %443 = vmatprep.mubr.msk.bf16.mxu1 %vm571_vm0, %v570_v0  ;;  %v462_v6 = vld [vmem:[#allocation5 + $0x10] sm:$0xff]   ;;  %v463_v7 = vld [vmem:[#allocation5 + $0x8] sm:$0xff]   ;;  %v464_v8 = vld [vmem:[#allocation5] sm:$0xff]   ;;  %v602_v20 = vshrl.u32 %v74_v19, 7  ;;  %s363_s2 = sshll.u32 %s572_s0, 4  ;;  %s364_s2 = int_to_ptr.vmem [resolvable:$true] %s363_s2 }
  0x29   :  { %408 = vmatpush3.bf16.msra.mxu0 %v457_v1  ;;  %v55_v9 = vld [vmem:[#allocation2] sm:$0xff]  ;;  %v466_v12 = vld [vmem:[#allocation5 + $0x70] sm:$0xff]   ;;  %v467_v13 = vld [vmem:[#allocation5 + $0x68] sm:$0xff]   ;;  %s537_s30 = scalar_lea.vmem %s364_s2, 128  ;;  %p542_p2 = scmp.lt.s32.totalorder %s364_s2, %s364_s2 }
  0x2a   :  { %409 = vmatprep.subr.bf16.mxu0 %v570_v0  ;;  %v73_v10 = vpack.c.bf16 %v55_v9, %v55_v9  ;;  %v465_v11 = vld [vmem:[#allocation5 + $0x78] sm:$0xff]   ;;  %v468_v14 = vld [vmem:[#allocation5 + $0x60] sm:$0xff]   ;;  %v470_v16 = vld [vmem:[#allocation5 + $0x50] sm:$0xff]   ;;  %v76_v21 = vsub.s32 0, %v602_v20  ;;  %v197_v52 = vsub.s32 1, %v602_v20  ;;  %v202_v56 = vsub.s32 2, %v602_v20  ;;  %p538_p1 = scmp.ne.s32.totalorder %s364_s2, %s537_s30  ;;  %p543_p3 = scmp.lt.s32.totalorder %s537_s30, %s537_s30 }
  0x2b   :  { %428 = vmatpush3.bf16.msra.mxu1 %v465_v11  ;;  %v469_v15 = vld [vmem:[#allocation5 + $0x58] sm:$0xff]   ;;  %v471_v17 = vld [vmem:[#allocation5 + $0x48] sm:$0xff]   ;;  %v472_v18 = vld [vmem:[#allocation5 + $0x40] sm:$0xff]  }
  0x2c   :  { %429 = vmatprep.subr.bf16.mxu1 %v570_v0  ;;  %v72_v22 = vld [vmem:[#allocation7] sm:$0xff]  ;;  %v223_v62 = vld [vmem:[#allocation7 + $0x8] sm:$0xff]  ;;  %p544_p4 = por %p543_p3, %p542_p2 }
  0x2d   :  { %410 = vmatpush3.bf16.msra.mxu0 %v458_v2  ;;  %v77_v23 = vrot.slane %v72_v22, %v76_v21  ;;  %v228_v63 = vrot.slane %v223_v62, %v76_v21 }
  0x2e   :  { %411 = vmatprep.subr.bf16.mxu0 %v570_v0  ;;  %p545_p5 = pnand %p544_p4, %p538_p1 }
  0x2f   :  { %430 = vmatpush3.bf16.msra.mxu1 %v466_v12 }
  0x30   :  { %431 = vmatprep.subr.bf16.mxu1 %v570_v0 }
  0x31   :  { %412 = vmatpush3.bf16.msra.mxu0 %v459_v3 }
  0x32   :  { %413 = vmatprep.subr.bf16.mxu0 %v570_v0 }
  0x33   :  { %432 = vmatpush3.bf16.msra.mxu1 %v467_v13 }
  0x34   :  { %433 = vmatprep.subr.bf16.mxu1 %v570_v0 }
  0x35   :  { %414 = vmatpush3.bf16.msra.mxu0 %v460_v4 }
  0x36   :  { %415 = vmatprep.subr.bf16.mxu0 %v570_v0 }
  0x37   :  { %434 = vmatpush3.bf16.msra.mxu1 %v468_v14 }
  0x38   :  { %435 = vmatprep.subr.bf16.mxu1 %v570_v0 }
  0x39   :  { %416 = vmatpush3.bf16.msra.mxu0 %v461_v5 }
  0x3a   :  { %417 = vmatprep.subr.bf16.mxu0 %v570_v0 }
  0x3b   :  { %436 = vmatpush3.bf16.msra.mxu1 %v469_v15 }
  0x3c   :  { %437 = vmatprep.subr.bf16.mxu1 %v570_v0 }
  0x3d   :  { %418 = vmatpush3.bf16.msra.mxu0 %v462_v6 }
  0x3e   :  { %419 = vmatprep.subr.bf16.mxu0 %v570_v0 }
  0x3f   :  { %438 = vmatpush3.bf16.msra.mxu1 %v470_v16 }
  0x40   :  { %439 = vmatprep.subr.bf16.mxu1 %v570_v0 }
  0x41   :  { %420 = vmatpush3.bf16.msra.mxu0 %v463_v7 }
  0x42   :  { %421 = vmatprep.subr.bf16.mxu0 %v570_v0 }
  0x43   :  { %440 = vmatpush3.bf16.msra.mxu1 %v471_v17 }
  0x44   :  { %441 = vmatprep.subr.bf16.mxu1 %v570_v0 }
  0x45   :  { %422 = vmatpush3.bf16.msra.mxu0 %v464_v8 }
  0x47   :  { %442 = vmatpush3.bf16.msra.mxu1 %v472_v18 }
  0x48   :  { %424 = vmatmul.mubr.bf16.vlgmr.msra.gmra.mxu0 %v73_v10 }
 0x108   :  { %v160_v24 = vpop.f32.mrf.mxu0 }
 0x109   :  { %v161_v25 = vadd.f32 %v160_v24, %v77_v23 }
 0x10a   :  { %v425_v26 = vpop.f32.mrf.mxu0 }
 0x10b   :  { %vm166_vm1 = vcmp.gt.f32.partialorder %v161_v25, 0.0  ;;  %v167_v27 = vmul.f32 0.2, %v161_v25 }
 0x10c   :  { %v163_v28 = vpop.f32.mrf.mxu0 }
 0x10d   :  { %v168_v29 = vsel %vm166_vm1, %v161_v25, %v167_v27 }
 0x10e   :  { %v169_v30 = vrot.slane %v168_v29, 4  ;;  %v175_v31 = vmul.f32 %v168_v29, %v168_v29  ;;  %v426_v32 = vpop.f32.mrf.mxu0 }
 0x110   :  { %v170_v33 = vadd.f32 %v169_v30, %v168_v29  ;;  %v176_v34 = vrot.slane %v175_v31, 4 }
 0x112   :  { %v171_v35 = vrot.slane %v170_v33, 2  ;;  %v177_v36 = vadd.f32 %v176_v34, %v175_v31 }
 0x114   :  { %v172_v37 = vadd.f32 %v171_v35, %v170_v33  ;;  %v178_v38 = vrot.slane %v177_v36, 2 }
 0x116   :  { %v173_v39 = vrot.slane %v172_v37, 1  ;;  %v179_v40 = vadd.f32 %v178_v38, %v177_v36 }
 0x118   :  { %v174_v41 = vadd.f32 %v173_v39, %v172_v37  ;;  %v180_v42 = vrot.slane %v179_v40, 1 }
 0x11a   :  { %v181_v43 = vadd.f32 %v180_v42, %v179_v40  ;;  %v182_v44 = vmul.f32 0.125, %v174_v41 }
 0x11c   :  { %v183_v45 = vmul.f32 0.125, %v181_v43  ;;  %v184_v46 = vmul.f32 %v182_v44, %v182_v44 }
 0x11e   :  { %v185_v47 = vsub.f32 %v183_v45, %v184_v46 }
 0x120   :  { %v186_v48 = vmax.f32 %v185_v47, 0.0 }
 0x122   :  { %v187_v49 = vadd.f32 1e-05, %v186_v48 }
 0x124   :  { %473 = vrsqrt.f32 %v187_v49 }
 0x131   :  { %v474_v50 = vpop.eup %473 }
 0x132   :  { %v189_v51 = vmul.f32 %v474_v50, %v72_v22 }
 0x134   :  { %v190_v53 = vmul.f32 %v189_v51, %v182_v44  ;;  %v198_v55 = vrot.slane %v189_v51, %v197_v52 }
 0x136   :  { %v192_v54 = vrot.slane %v190_v53, 7  ;;  %v199_v58 = vmul.f32 %v198_v55, %v168_v29 }
 0x138   :  { %v194_v57 = vsub.f32 %v72_v22, %v192_v54 }
 0x13a   :  { %v203_v59 = vrot.slane %v194_v57, %v202_v56 }
 0x13c   :  { %v204_v60 = vadd.f32 %v203_v59, %v199_v58 }
 0x13e   :  { %v224_v61 = vpack.c.bf16 %v204_v60, %v204_v60 }
 0x140   :  { %444 = vmatmul.mubr.bf16.vlgmr.msra.gmra.mxu1 %v224_v61 }
 0x200   :  { %v311_v0 = vpop.f32.mrf.mxu1 }
 0x201   :  { %v312_v1 = vadd.f32 %v311_v0, %v228_v63 }
 0x202   :  { %v445_v2 = vpop.f32.mrf.mxu1 }
 0x203   :  { %vm317_vm2 = vcmp.gt.f32.partialorder %v312_v1, 0.0  ;;  %v318_v3 = vmul.f32 0.2, %v312_v1 }
 0x204   :  { %v314_v4 = vpop.f32.mrf.mxu1 }
 0x205   :  { %v319_v5 = vsel %vm317_vm2, %v312_v1, %v318_v3 }
 0x206   :  { %v320_v6 = vrot.slane %v319_v5, 4  ;;  %v326_v7 = vmul.f32 %v319_v5, %v319_v5  ;;  %v446_v8 = vpop.f32.mrf.mxu1 }
 0x208   :  { %v321_v9 = vadd.f32 %v320_v6, %v319_v5  ;;  %v327_v10 = vrot.slane %v326_v7, 4 }
 0x20a   :  { %v322_v11 = vrot.slane %v321_v9, 2  ;;  %v328_v12 = vadd.f32 %v327_v10, %v326_v7 }
 0x20c   :  { %v323_v13 = vadd.f32 %v322_v11, %v321_v9  ;;  %v329_v14 = vrot.slane %v328_v12, 2 }
 0x20e   :  { %v324_v15 = vrot.slane %v323_v13, 1  ;;  %v330_v16 = vadd.f32 %v329_v14, %v328_v12 }
 0x210   :  { %v325_v17 = vadd.f32 %v324_v15, %v323_v13  ;;  %v331_v18 = vrot.slane %v330_v16, 1 }
 0x212   :  { %v332_v19 = vadd.f32 %v331_v18, %v330_v16  ;;  %v333_v20 = vmul.f32 0.125, %v325_v17 }
 0x214   :  { %v334_v21 = vmul.f32 0.125, %v332_v19  ;;  %v335_v22 = vmul.f32 %v333_v20, %v333_v20 }
 0x216   :  { %v336_v23 = vsub.f32 %v334_v21, %v335_v22 }
 0x218   :  { %v337_v24 = vmax.f32 %v336_v23, 0.0 }
 0x21a   :  { %v338_v25 = vadd.f32 1e-05, %v337_v24 }
 0x21c   :  { %475 = vrsqrt.f32 %v338_v25 }
 0x229   :  { %v476_v26 = vpop.eup %475 }
 0x22a   :  { %v340_v27 = vmul.f32 %v476_v26, %v223_v62 }
 0x22c   :  { %v341_v28 = vmul.f32 %v340_v27, %v333_v20  ;;  %v349_v30 = vrot.slane %v340_v27, %v197_v52 }
 0x22e   :  { %v343_v29 = vrot.slane %v341_v28, 7  ;;  %v350_v32 = vmul.f32 %v349_v30, %v319_v5 }
 0x230   :  { %v345_v31 = vsub.f32 %v223_v62, %v343_v29 }
 0x232   :  { %v354_v33 = vrot.slane %v345_v31, %v202_v56 }
 0x234   :  { %v355_v34 = vadd.f32 %v354_v33, %v350_v32 }
 0x236   :  { %356 = vst [vmem:[#allocation8] sm:$0xff] %v355_v34 }
 0x237   :  { %548 = shalt.err (!%p545_p5)
}
 0x238   :  { %366 = dma.vmem_to_hbm [thread:$0]  %s364_s2, 128, %s613_s3, [#allocation4]  }
 0x239   :  { %561 = dma.done.wait [#allocation4], 128  }
 0x23a   :  { %562 = vsyncadd [#allocation4], 4294967168 }
 0x23b   :  { %370 = vsyncpa [#allocation3], 1 }
 0x23c   :  { %371 = vsyncpa [#allocation6], 1 }
 0x23d   :  { %372 = vsyncpa [#allocation4], 1 }

</bundles_post_ra>
